<compile_context>
chip_gen: v6e
topology: v6e:2x2x1
jax: 0.10.0
libtpu: 0.0.40
codegen_flags: <defaults>
</compile_context>

<pallas_src>
import jax
import jax.numpy as jnp
import numpy as np
from jax.experimental import pallas as pl
from jax.experimental.pallas import tpu as pltpu


# ----------------------------- Pallas kernel --------------------------------
def cae_kernel(patches_ref, wc_ref, bc_ref, wdec_ref, bdec_ref, out_ref):
    # Encoder (VPU + XLU), already in flattened layout f = h*P + p:
    #   act[0, f] = relu(bc[h] + sum_k wc[h, k] * patches[k, p])
    # patches_ref/wc_ref are (K, hidden*P); one elementwise multiply, one 4-row
    # sublane reduction, one bias-add + ReLU.  No MXU involvement.
    prod = wc_ref[...] * patches_ref[...]                              # (K, hidden*P)
    act = jnp.maximum(jnp.sum(prod, axis=0, keepdims=True) + bc_ref[...], 0.0)  # (1, hidden*P)

    # Decoder: single MXU matmul (1, hidden*P) @ (hidden*P, OUT_PAD) -> (1, OUT_PAD),
    # then bias add.  Output store is lane-dense (128 lanes, unmasked vst).
    out = jnp.dot(act, wdec_ref[...], preferred_element_type=jnp.float32)
    out_ref[...] = out + bdec_ref[...]


# ------------------------------- Wrapper -------------------------------------
def make_conv_autoencoder_forward(wc, bc, wd, bd, *, kernel_size=2):
    """Build a jitted forward(x) closure.

    All weight transforms (conv-weight broadcast into flattened layout, decoder
    weight transpose/pad, bias pad) run exactly once here and are closed over by
    the jitted forward().  Per call only the tiny im2col + lane-tile of the input
    remains (fused by XLA into the dispatch feeding the pallas_call).
    Matches torch semantics: decoder(relu(encoder(X).flatten())), N == 1.
    """
    hidden, in_channels, kh, kw = wc.shape
    assert kh == kw == kernel_size
    out_features, hp = wd.shape
    K = in_channels * kh * kw
    P = hp // hidden                                             # = band_length = Ho*Wo
    F = hidden * P                                               # flattened feature length
    OUT_PAD = max(128, ((out_features + 127) // 128) * 128)      # lane-dense output width

    # ---- once-per-parameter-set preprocessing (hoisted) ----
    # Conv weight in flattened layout: wc_flat[k, h*P + p] = wc[h, c, ki, kj], k=(c,ki,kj)
    wc_r = jnp.asarray(wc, jnp.float32).reshape(hidden, K)                 # (hidden, K)
    wc_flat = jnp.broadcast_to(wc_r.T[:, :, None], (K, hidden, P)).reshape(K, F)
    # Conv bias in flattened layout: bc_flat[0, h*P + p] = bc[h]
    bc_flat = jnp.broadcast_to(jnp.asarray(bc, jnp.float32)[:, None],
                               (hidden, P)).reshape(1, F)
    # Decoder weight: torch flatten index f = h*P + p  ->  wdec_flat[f, o] = wd[o, f]
    wdec_flat = jnp.pad(jnp.asarray(wd, jnp.float32).T,
                        ((0, 0), (0, OUT_PAD - out_features)))             # (F, OUT_PAD)
    bd_pad = jnp.pad(jnp.asarray(bd, jnp.float32),
                     (0, OUT_PAD - out_features)).reshape(1, OUT_PAD)

    kernel_fn = pl.pallas_call(
        cae_kernel,
        out_shape=jax.ShapeDtypeStruct((1, OUT_PAD), jnp.float32),
        in_specs=[pl.BlockSpec(memory_space=pltpu.MemorySpace.VMEM)] * 5,
        out_specs=pl.BlockSpec(memory_space=pltpu.MemorySpace.VMEM),
    )

    @jax.jit
    def forward(x):
        N, C, H, W = x.shape
        assert N == 1, "torch .flatten() flattens batch; model only works with N=1"
        assert C == in_channels
        Ho, Wo = H - kh + 1, W - kw + 1
        assert Ho * Wo == P, "spatial size inconsistent with decoder in_features"

        # im2col of the tiny input into (K, P), tap order (c, ki, kj), position
        # order p = i*Wo + j (matches torch's conv-output flatten), then tiled
        # along lanes to the flattened layout (K, hidden*P).
        rows = []
        for c in range(C):
            for ki in range(kh):
                for kj in range(kw):
                    rows.append(x[0, c, ki:ki + Ho, kj:kj + Wo].reshape(Ho * Wo))
        patches = jnp.stack(rows, axis=0).astype(jnp.float32)     # (K, P)
        patches_flat = jnp.tile(patches, (1, hidden))              # (K, hidden*P)

        out_padded = kernel_fn(patches_flat, wc_flat, bc_flat, wdec_flat, bd_pad)
        return out_padded[0, :out_features]                        # (out_features,), like torch

    return forward


# ----------------------------- JAX reference ---------------------------------
def reference_forward(x, wc, bc, wd, bd):
    conv = jax.lax.conv_general_dilated(
        x, wc, window_strides=(1, 1), padding="VALID",
        dimension_numbers=("NCHW", "OIHW", "NCHW"))
    conv = conv + bc[None, :, None, None]
    act = jnp.maximum(conv, 0.0)
    flat = act.reshape(-1)                                         # torch .flatten()
    return wd @ flat + bd


if __name__ == "__main__":
    # Shapes consistent with the module:
    # in_channels=1, hidden=16, kernel=2, spatial 9x9 -> band_length = 8*8 = 64
    in_channels, hidden, kernel_size = 1, 16, 2
    H = W = 9
    band_length = (H - kernel_size + 1) * (W - kernel_size + 1)    # 64
    out_features = 32

    key = jax.random.PRNGKey(0)
    k1, k2, k3, k4, k5 = jax.random.split(key, 5)
    x = jax.random.normal(k1, (1, in_channels, H, W), dtype=jnp.float32)
    wc = jax.random.normal(k2, (hidden, in_channels, kernel_size, kernel_size),
                           jnp.float32) * 0.1
    bc = jax.random.normal(k3, (hidden,), jnp.float32) * 0.1
    wd = jax.random.normal(k4, (out_features, hidden * band_length), jnp.float32) * 0.05
    bd = jax.random.normal(k5, (out_features,), jnp.float32) * 0.05

    forward = make_conv_autoencoder_forward(wc, bc, wd, bd, kernel_size=kernel_size)
    y_kernel = jax.block_until_ready(forward(x))
    y_ref = jax.block_until_ready(reference_forward(x, wc, bc, wd, bd))

    assert y_kernel.shape == (out_features,)
    np.testing.assert_allclose(np.asarray(y_kernel), np.asarray(y_ref),
                               rtol=1e-4, atol=1e-4)
    print("KERNEL_OK")
</pallas_src>

<mosaic_0001>
module attributes {stable_mosaic.version = 11 : i64} {
  func.func @cae_kernel(%arg0: memref<4x1024xf32, #tpu.memory_space<vmem>>, %arg1: memref<4x1024xf32, #tpu.memory_space<vmem>>, %arg2: memref<1x1024xf32, #tpu.memory_space<vmem>>, %arg3: memref<1024x128xf32, #tpu.memory_space<vmem>>, %arg4: memref<1x128xf32, #tpu.memory_space<vmem>>, %arg5: memref<1x128xf32, #tpu.memory_space<vmem>>) attributes {dimension_semantics = [], scalar_prefetch = 0 : i64, scratch_operands = 0 : i64, tpu.core_type = #tpu.core_type<tc>} {
    %c0 = arith.constant 0 : index
    %c0_0 = arith.constant 0 : index
    %0 = vector.load %arg1[%c0, %c0_0] : memref<4x1024xf32, #tpu.memory_space<vmem>>, vector<4x1024xf32>
    %c0_1 = arith.constant 0 : index
    %c0_2 = arith.constant 0 : index
    %1 = vector.load %arg0[%c0_1, %c0_2] : memref<4x1024xf32, #tpu.memory_space<vmem>>, vector<4x1024xf32>
    %2 = arith.mulf %0, %1 : vector<4x1024xf32>
    %cst = arith.constant dense<0.000000e+00> : vector<1024xf32>
    %3 = vector.multi_reduction <add>, %2, %cst [0] : vector<4x1024xf32> to vector<1024xf32>
    %4 = vector.shape_cast %3 : vector<1024xf32> to vector<1x1024xf32>
    %c0_3 = arith.constant 0 : index
    %c0_4 = arith.constant 0 : index
    %5 = vector.load %arg2[%c0_3, %c0_4] : memref<1x1024xf32, #tpu.memory_space<vmem>>, vector<1x1024xf32>
    %6 = arith.addf %4, %5 : vector<1x1024xf32>
    %cst_5 = arith.constant 0.000000e+00 : f32
    %7 = vector.broadcast %cst_5 : f32 to vector<1x1024xf32>
    %8 = arith.maximumf %6, %7 : vector<1x1024xf32>
    %c0_6 = arith.constant 0 : index
    %c0_7 = arith.constant 0 : index
    %9 = vector.load %arg3[%c0_6, %c0_7] : memref<1024x128xf32, #tpu.memory_space<vmem>>, vector<1024x128xf32>
    %cst_8 = arith.constant dense<0.000000e+00> : vector<1x128xf32>
    %10 = tpu.matmul %8, %9, %cst_8 {dimension_numbers = #tpu.dot_dimension_numbers<[1], [0], [0], [1], [0, 0, 1, 1], [], []>} : vector<1x1024xf32>, vector<1024x128xf32>, vector<1x128xf32> -> vector<1x128xf32>
    %c0_9 = arith.constant 0 : index
    %c0_10 = arith.constant 0 : index
    %11 = vector.load %arg4[%c0_9, %c0_10] : memref<1x128xf32, #tpu.memory_space<vmem>>, vector<1x128xf32>
    %12 = arith.addf %10, %11 : vector<1x128xf32>
    %c0_11 = arith.constant 0 : index
    %c0_12 = arith.constant 0 : index
    %13 = vector.load %arg5[%c0_11, %c0_12] : memref<1x128xf32, #tpu.memory_space<vmem>>, vector<1x128xf32>
    tpu.vector_store %arg5[%c0_11, %c0_12], %12 {strides = array<i32>} : memref<1x128xf32, #tpu.memory_space<vmem>>, vector<1x128xf32>,
    return
  }
}

</mosaic_0001>

<bundles_post_ra>
// kernel: squeeze.5
= control target key start
LH: loop header
LB: loop body
LE: loop exit
PB: predicated region body
PF: predicated region fallthrough
CT: control target
= control target key end

     0   :  { %s69_s10 = smov 56   ;;  %s70_s11 = smov 40   ;;  %vm3_vm0 = vcmask 64512   ;;  %vm9_vm1 = vcmask 523712   ;;  %vm15_vm2 = vcmask 458112   ;;  %vm21_vm3 = vcmask 392512   ;;  %s113_s0 = inlined_call_operand.vmem [shape: f32[8,8], index: 0, kind: input, shape index: {}]   ;;  %s114_s1 = inlined_call_operand.vmem [shape: f32[1,64], index: 1, kind: output, shape index: {}]  }
   0x1   :  { %v55_v0 = vld [vmem:[%s113_s0 + $0x7] sm:$0x1]   ;;  %v57_v1 = vld [vmem:[%s113_s0 + $0x5] sm:$0x1]   ;;  %v56_v2 = vld [vmem:[%s113_s0 + $0x6] sm:$0x1]  }
   0x2   :  { %7 = vrot.lane.b32.xlu0 %v55_v0, %s69_s10  ;;  %19 = vrot.lane.b32.xlu1 %v57_v1, %s70_s11  ;;  %v58_v3 = vld [vmem:[%s113_s0 + $0x4] sm:$0x1]   ;;  %v2_v4 = vld [vmem:[%s113_s0] sm:$0x1]   ;;  %s71_s18 = smov 48   ;;  %s72_s19 = smov 32  }
   0x3   :  { %4 = vst.msk [vmem:[#allocation0] sm:$0x1] %vm3_vm0, %v2_v4   ;;  %v59_v5 = vld [vmem:[%s113_s0 + $0x3] sm:$0x1]   ;;  %v60_v6 = vld [vmem:[%s113_s0 + $0x2] sm:$0x1]  }
   0x4   :  { %s73_s24 = smov 24   ;;  %s74_s25 = smov 16   ;;  %v61_v7 = vld [vmem:[%s113_s0 + $0x1] sm:$0x1]   ;;  %vm27_vm4 = vcmask 326912   ;;  %vm33_vm5 = vcmask 261312  }
   0x5   :  { %s75_s0 = smov 8   ;;  %vm39_vm6 = vcmask 195712   ;;  %vm45_vm7 = vcmask 130112  }
   0x6   :  { %13 = vrot.lane.b32.xlu0 %v56_v2, %s71_s18  ;;  %25 = vrot.lane.b32.xlu1 %v58_v3, %s72_s19 }
   0xa   :  { %31 = vrot.lane.b32.xlu0 %v59_v5, %s73_s24  ;;  %37 = vrot.lane.b32.xlu1 %v60_v6, %s74_s25 }
   0xe   :  { %43 = vrot.lane.b32.xlu0 %v61_v7, %s75_s0 }
  0x74   :  { %v8_v8 = vpop.permute.xlu0 %7   ;;  %v20_v9 = vpop.permute.xlu1 %19  }
  0x75   :  { %10 = vst.msk [vmem:[#allocation0] sm:$0x1] %vm9_vm1, %v8_v8  }
  0x78   :  { %v14_v10 = vpop.permute.xlu0 %13   ;;  %v26_v11 = vpop.permute.xlu1 %25  }
  0x79   :  { %16 = vst.msk [vmem:[#allocation0] sm:$0x1] %vm15_vm2, %v14_v10  }
  0x7a   :  { %22 = vst.msk [vmem:[#allocation0] sm:$0x1] %vm21_vm3, %v20_v9  }
  0x7b   :  { %28 = vst.msk [vmem:[#allocation0] sm:$0x1] %vm27_vm4, %v26_v11  }
  0x7c   :  { %v32_v12 = vpop.permute.xlu0 %31   ;;  %v38_v13 = vpop.permute.xlu1 %37  }
  0x7d   :  { %34 = vst.msk [vmem:[#allocation0] sm:$0x1] %vm33_vm5, %v32_v12  }
  0x7e   :  { %40 = vst.msk [vmem:[#allocation0] sm:$0x1] %vm39_vm6, %v38_v13  }
  0x80   :  { %v44_v14 = vpop.permute.xlu0 %43  }
  0x81   :  { %46 = vst.msk [vmem:[#allocation0] sm:$0x1] %vm45_vm7, %v44_v14  }
  0x88   :  { %v51_v15 = vld [vmem:[#allocation0] sm:$0x1] }
  0x89   :  { %54 = vst [vmem:[%s114_s1] sm:$0x1] %v51_v15 }

// kernel: tile.9
= control target key start
LH: loop header
LB: loop body
LE: loop exit
PB: predicated region body
PF: predicated region fallthrough
CT: control target
= control target key end

     0   :  { %vm33_vm0 = vcmask 1043458   ;;  %s77_s6 = smov 3  ;;  %vm38_vm1 = vcmask 1045508   ;;  %vm43_vm2 = vcmask 1047558   ;;  %s80_s9 = smov 12  ;;  %vm3_vm3 = vcmask 523264   ;;  %s334_s0 = inlined_call_operand.vmem [shape: f32[4,16,64], index: 0, kind: input, shape index: {}]   ;;  %s335_s1 = inlined_call_operand.vmem [shape: f32[4,1024], index: 1, kind: output, shape index: {}]  }
   0x1   :  { %v199_v0 = vld [vmem:[%s334_s0 + $0x5] ss:$16 sm:%s77_s6]   ;;  %s85_s10 = smov 48  ;;  %s90_s15 = smov 192  ;;  %v2_v3 = vld [vmem:[%s334_s0] ss:$2 sm:$0xff]  }
   0x2   :  { %v200_v1 = vld [vmem:[%s334_s0 + $0x5] ss:$16 sm:%s80_s9]   ;;  %v201_v2 = vld [vmem:[%s334_s0 - $0x39] ss:$16 sm:%s85_s10]   ;;  %s28_s16 = smov 3  ;;  %s31_s23 = smov 12 }
   0x3   :  { %v83_v4 = vsel %vm33_vm0, %v200_v1, %v199_v0  ;;  %v202_v5 = vld [vmem:[%s334_s0 - $0x39] ss:$16 sm:%s90_s15]   ;;  %v191_v6 = vld [vmem:[%s334_s0 + $0x1] ss:$16 sm:%s28_s16]   ;;  %s36_s24 = smov 48  ;;  %s41_s29 = smov 192 }
   0x4   :  { %v88_v7 = vsel %vm38_vm1, %v201_v2, %v83_v4  ;;  %v192_v8 = vld [vmem:[%s334_s0 + $0x1] ss:$16 sm:%s31_s23]   ;;  %v193_v9 = vld [vmem:[%s334_s0 - $0x3d] ss:$16 sm:%s36_s24]   ;;  %s102_s30 = smov 3  ;;  %s105_s6 = smov 12 }
   0x5   :  { %v93_v10 = vsel %vm43_vm2, %v202_v5, %v88_v7  ;;  %v34_v11 = vsel %vm33_vm0, %v192_v8, %v191_v6  ;;  %v194_v12 = vld [vmem:[%s334_s0 - $0x3d] ss:$16 sm:%s41_s29]   ;;  %v203_v13 = vld [vmem:[%s334_s0 + $0xd] ss:$16 sm:%s102_s30]   ;;  %s110_s7 = smov 48  ;;  %s215_s8 = smov 64  }
   0x6   :  { %94 = vrot.lane.b32.xlu1 %v93_v10, %s215_s8  ;;  %v39_v14 = vsel %vm38_vm1, %v193_v9, %v34_v11  ;;  %v204_v15 = vld [vmem:[%s334_s0 + $0xd] ss:$16 sm:%s105_s6]   ;;  %s115_s11 = smov 192  ;;  %s52_s12 = smov 3  ;;  %v188_v22 = vld [vmem:[%s334_s0 + $0x10] ss:$2 sm:$0xff]  }
   0x7   :  { %v44_v16 = vsel %vm43_vm2, %v194_v12, %v39_v14  ;;  %v108_v17 = vsel %vm33_vm0, %v204_v15, %v203_v13  ;;  %v205_v18 = vld [vmem:[%s334_s0 - $0x31] ss:$16 sm:%s110_s7]   ;;  %s55_s17 = smov 12  ;;  %s60_s18 = smov 48  ;;  %v195_v21 = vld [vmem:[%s334_s0 + $0x9] ss:$16 sm:%s52_s12]  }
   0x8   :  { %v206_v19 = vld [vmem:[%s334_s0 - $0x31] ss:$16 sm:%s115_s11]   ;;  %4 = vst.msk [vmem:[#allocation0] ss:$8 sm:$0xf] %vm3_vm3, %v2_v3   ;;  %45 = vrot.lane.b32.xlu0 %v44_v16, %s215_s8  ;;  %v113_v20 = vsel %vm38_vm1, %v205_v18, %v108_v17  ;;  %s65_s21 = smov 192 }
   0x9   :  { %5 = vst.msk [vmem:[#allocation0] ss:$8 sm:$0xf0] %vm3_vm3, %v2_v3   ;;  %v118_v23 = vsel %vm43_vm2, %v206_v19, %v113_v20  ;;  %v196_v24 = vld [vmem:[%s334_s0 + $0x9] ss:$16 sm:%s55_s17]   ;;  %vm47_vm4 = vcmask 1048064  }
   0xa   :  { %v197_v25 = vld [vmem:[%s334_s0 - $0x35] ss:$16 sm:%s60_s18]   ;;  %10 = vst.msk [vmem:[#allocation0 + $0x1] ss:$8 sm:$0xf] %vm3_vm3, %v188_v22   ;;  %119 = vrot.lane.b32.xlu1 %v118_v23, %s215_s8  ;;  %v58_v26 = vsel %vm33_vm0, %v196_v24, %v195_v21 }
   0xb   :  { %12 = vst.msk [vmem:[#allocation0 + $0x1] ss:$8 sm:$0xf0] %vm3_vm3, %v188_v22   ;;  %v198_v27 = vld [vmem:[%s334_s0 - $0x35] ss:$16 sm:%s65_s21]   ;;  %v63_v29 = vsel %vm38_vm1, %v197_v25, %v58_v26 }
   0xc   :  { %v189_v28 = vld [vmem:[%s334_s0 + $0x20] ss:$2 sm:$0xff]   ;;  %v190_v30 = vld [vmem:[%s334_s0 + $0x30] ss:$2 sm:$0xff]   ;;  %v68_v31 = vsel %vm43_vm2, %v198_v27, %v63_v29 }
   0xd   :  { %17 = vst.msk [vmem:[#allocation0 + $0x2] ss:$8 sm:$0xf] %vm3_vm3, %v189_v28   ;;  %19 = vst.msk [vmem:[#allocation0 + $0x2] ss:$8 sm:$0xf0] %vm3_vm3, %v189_v28   ;;  %69 = vrot.lane.b32.xlu0 %v68_v31, %s215_s8 }
   0xe   :  { %24 = vst.msk [vmem:[#allocation0 + $0x3] ss:$8 sm:$0xf] %vm3_vm3, %v190_v30   ;;  %26 = vst.msk [vmem:[#allocation0 + $0x3] ss:$8 sm:$0xf0] %vm3_vm3, %v190_v30  }
  0x78   :  { %v95_v32 = vpop.permute.xlu1 %94  }
  0x79   :  { %98 = vst.msk [vmem:[#allocation0 + $0x10] sm:$0xf] %vm47_vm4, %v95_v32   ;;  %100 = vst.msk [vmem:[#allocation0 + $0x14] sm:$0xf0] %vm47_vm4, %v95_v32  }
  0x7a   :  { %v46_v33 = vpop.permute.xlu0 %45  }
  0x7b   :  { %48 = vst.msk [vmem:[#allocation0] sm:$0xf] %vm47_vm4, %v46_v33   ;;  %50 = vst.msk [vmem:[#allocation0 + $0x4] sm:$0xf0] %vm47_vm4, %v46_v33  }
  0x7c   :  { %v120_v34 = vpop.permute.xlu1 %119  }
  0x7d   :  { %123 = vst.msk [vmem:[#allocation0 + $0x30] sm:$0xf] %vm47_vm4, %v120_v34   ;;  %125 = vst.msk [vmem:[#allocation0 + $0x34] sm:$0xf0] %vm47_vm4, %v120_v34  }
  0x7f   :  { %v70_v35 = vpop.permute.xlu0 %69  }
  0x80   :  { %v141_v36 = vld [vmem:[#allocation0 + $0x10] sm:$0xf]  ;;  %v148_v37 = vld [vmem:[#allocation0 + $0x18] sm:$0xf]  ;;  %73 = vst.msk [vmem:[#allocation0 + $0x20] sm:$0xf] %vm47_vm4, %v70_v35  }
  0x81   :  { %75 = vst.msk [vmem:[#allocation0 + $0x24] sm:$0xf0] %vm47_vm4, %v70_v35   ;;  %208 = vst [vmem:[%s335_s1 + $0x8] sm:$0xf] %v141_v36 }
  0x82   :  { %209 = vst [vmem:[%s335_s1 + $0xc] sm:$0xf] %v148_v37  ;;  %v130_v38 = vld [vmem:[#allocation0] sm:$0xf]  ;;  %v135_v39 = vld [vmem:[#allocation0 + $0x8] sm:$0xf] }
  0x83   :  { %133 = vst [vmem:[%s335_s1] sm:$0xf] %v130_v38  ;;  %207 = vst [vmem:[%s335_s1 + $0x4] sm:$0xf] %v135_v39 }
  0x84   :  { %v169_v40 = vld [vmem:[#allocation0 + $0x30] sm:$0xf]  ;;  %v176_v41 = vld [vmem:[#allocation0 + $0x38] sm:$0xf] }
  0x85   :  { %212 = vst [vmem:[%s335_s1 + $0x18] sm:$0xf] %v169_v40  ;;  %213 = vst [vmem:[%s335_s1 + $0x1c] sm:$0xf] %v176_v41 }
  0x87   :  { %v155_v42 = vld [vmem:[#allocation0 + $0x20] sm:$0xf] }
  0x88   :  { %v162_v43 = vld [vmem:[#allocation0 + $0x28] sm:$0xf]  ;;  %210 = vst [vmem:[%s335_s1 + $0x10] sm:$0xf] %v155_v42 }
  0x89   :  { %211 = vst [vmem:[%s335_s1 + $0x14] sm:$0xf] %v162_v43 }

// kernel: forward.1
= control target key start
LH: loop header
LB: loop body
LE: loop exit
PB: predicated region body
PF: predicated region fallthrough
CT: control target
= control target key end

     0   :  { %10 = vsyncpa [#allocation3], 0  ;;  %s753_s18 = smov [#allocation2]   ;;  %s850_s0 = inlined_call_operand.vmem [shape: f32[4,1024], index: 0, kind: input, shape index: {}]   ;;  %s851_s1 = inlined_call_operand.vmem [shape: f32[4,1024], index: 1, kind: input, shape index: {}]   ;;  %s852_s2 = inlined_call_operand.vmem [shape: f32[1,1024], index: 2, kind: input, shape index: {}]   ;;  %s853_s3 = inlined_call_operand.hbm [shape: f32[1024,128], index: 3, kind: input, shape index: {}]   ;;  %s854_s4 = inlined_call_operand.vmem [shape: f32[1,128], index: 4, kind: input, shape index: {}]   ;;  %s855_s5 = inlined_call_operand.vmem [shape: f32[1,128], index: 5, kind: output, shape index: {}]  }
   0x1   :  { %s22_s19 = sshll.u32 %s753_s18, 4  ;;  %s23_s19 = int_to_ptr.vmem [resolvable:$true] %s22_s19 }
   0x2   :  { %s739_s20 = scalar_lea.vmem %s23_s19, 16384  ;;  %p744_p1 = scmp.lt.s32.totalorder %s23_s19, %s23_s19 }
   0x3   :  { %p740_p0 = scmp.ne.s32.totalorder %s23_s19, %s739_s20  ;;  %p745_p2 = scmp.lt.s32.totalorder %s739_s20, %s739_s20 }
   0x5   :  { %p746_p3 = por %p745_p2, %p744_p1 }
   0x7   :  { %p747_p4 = pnand %p746_p3, %p740_p0 }
   0x9   :  { %750 = shalt.err (!%p747_p4)
}
   0xa   :  { %s754_s21 = smov 128   ;;  %s755_s22 = smov 8  }
   0xb   :  { %28 = dma.hbm_to_vmem [thread:$0]  %s853_s3, 16384, %s23_s19, [#allocation3], %s754_s21, %s754_s21, %s755_s22  }
   0xc   :  { %751 = dma.done.wait [#allocation3], 16384  }
   0xd   :  { %752 = vsyncadd [#allocation3], 4294950912  ;;  %v204_v0 = vld [vmem:[#allocation2 + $0xf8] sm:$0xff]  ;;  %v203_v4 = vld [vmem:[#allocation2 + $0xf0] sm:$0xff]  ;;  %vm58_vm0 = vcmask 1043456   ;;  %v117_v51 = vlaneseq }
   0xe   :  { %v236_v1 = vld [vmem:[#allocation2 + $0x1f8] sm:$0xff]  ;;  %588 = vmatprep.subr.mxu0 %v204_v0  ;;  %v235_v5 = vld [vmem:[#allocation2 + $0x1f0] sm:$0xff]  ;;  %v202_v8 = vld [vmem:[#allocation2 + $0xe8] sm:$0xff] }
   0xf   :  { %v188_v2 = vld [vmem:[#allocation2 + $0x78] sm:$0xff]  ;;  %623 = vmatprep.subr.mxu1 %v236_v1  ;;  %v187_v6 = vld [vmem:[#allocation2 + $0x70] sm:$0xff]  ;;  %v234_v9 = vld [vmem:[#allocation2 + $0x1e8] sm:$0xff]  ;;  %v802_v1 = vshrl.u32 %v117_v51, 7 }
  0x10   :  { %v220_v3 = vld [vmem:[#allocation2 + $0x178] sm:$0xff]  ;;  %589 = vmatpush3.msra.mxu0 %v188_v2  ;;  %v219_v7 = vld [vmem:[#allocation2 + $0x170] sm:$0xff]  ;;  %v186_v10 = vld [vmem:[#allocation2 + $0x68] sm:$0xff] }
  0x11   :  { %624 = vmatpush3.msra.mxu1 %v220_v3  ;;  %590 = vmatprep.subr.mxu0 %v203_v4  ;;  %v218_v11 = vld [vmem:[#allocation2 + $0x168] sm:$0xff]  ;;  %v201_v12 = vld [vmem:[#allocation2 + $0xe0] sm:$0xff]  ;;  %v200_v16 = vld [vmem:[#allocation2 + $0xd8] sm:$0xff] }
  0x12   :  { %625 = vmatprep.subr.mxu1 %v235_v5  ;;  %591 = vmatpush3.msra.mxu0 %v187_v6  ;;  %v233_v13 = vld [vmem:[#allocation2 + $0x1e0] sm:$0xff]  ;;  %v232_v17 = vld [vmem:[#allocation2 + $0x1d8] sm:$0xff]  ;;  %v199_v20 = vld [vmem:[#allocation2 + $0xd0] sm:$0xff] }
  0x13   :  { %626 = vmatpush3.msra.mxu1 %v219_v7  ;;  %592 = vmatprep.subr.mxu0 %v202_v8  ;;  %v185_v14 = vld [vmem:[#allocation2 + $0x60] sm:$0xff]  ;;  %v184_v18 = vld [vmem:[#allocation2 + $0x58] sm:$0xff]  ;;  %v231_v21 = vld [vmem:[#allocation2 + $0x1d0] sm:$0xff] }
  0x14   :  { %627 = vmatprep.subr.mxu1 %v234_v9  ;;  %v217_v15 = vld [vmem:[#allocation2 + $0x160] sm:$0xff]  ;;  %593 = vmatpush3.msra.mxu0 %v186_v10  ;;  %v216_v19 = vld [vmem:[#allocation2 + $0x158] sm:$0xff]  ;;  %v183_v22 = vld [vmem:[#allocation2 + $0x50] sm:$0xff] }
  0x15   :  { %628 = vmatpush3.msra.mxu1 %v218_v11  ;;  %594 = vmatprep.subr.mxu0 %v201_v12  ;;  %v215_v23 = vld [vmem:[#allocation2 + $0x150] sm:$0xff]  ;;  %v198_v24 = vld [vmem:[#allocation2 + $0xc8] sm:$0xff]  ;;  %v197_v28 = vld [vmem:[#allocation2 + $0xc0] sm:$0xff] }
  0x16   :  { %629 = vmatprep.subr.mxu1 %v233_v13  ;;  %595 = vmatpush3.msra.mxu0 %v185_v14  ;;  %v230_v25 = vld [vmem:[#allocation2 + $0x1c8] sm:$0xff]  ;;  %v229_v29 = vld [vmem:[#allocation2 + $0x1c0] sm:$0xff]  ;;  %v196_v32 = vld [vmem:[#allocation2 + $0xb8] sm:$0xff] }
  0x17   :  { %630 = vmatpush3.msra.mxu1 %v217_v15  ;;  %596 = vmatprep.subr.mxu0 %v200_v16  ;;  %v182_v26 = vld [vmem:[#allocation2 + $0x48] sm:$0xff]  ;;  %v181_v30 = vld [vmem:[#allocation2 + $0x40] sm:$0xff]  ;;  %v228_v33 = vld [vmem:[#allocation2 + $0x1b8] sm:$0xff] }
  0x18   :  { %631 = vmatprep.subr.mxu1 %v232_v17  ;;  %597 = vmatpush3.msra.mxu0 %v184_v18  ;;  %v214_v27 = vld [vmem:[#allocation2 + $0x148] sm:$0xff]  ;;  %v213_v31 = vld [vmem:[#allocation2 + $0x140] sm:$0xff]  ;;  %v180_v34 = vld [vmem:[#allocation2 + $0x38] sm:$0xff] }
  0x19   :  { %632 = vmatpush3.msra.mxu1 %v216_v19  ;;  %598 = vmatprep.subr.mxu0 %v199_v20  ;;  %v212_v35 = vld [vmem:[#allocation2 + $0x138] sm:$0xff]  ;;  %v195_v36 = vld [vmem:[#allocation2 + $0xb0] sm:$0xff]  ;;  %v194_v40 = vld [vmem:[#allocation2 + $0xa8] sm:$0xff] }
  0x1a   :  { %633 = vmatprep.subr.mxu1 %v231_v21  ;;  %599 = vmatpush3.msra.mxu0 %v183_v22  ;;  %v227_v37 = vld [vmem:[#allocation2 + $0x1b0] sm:$0xff]  ;;  %v226_v41 = vld [vmem:[#allocation2 + $0x1a8] sm:$0xff]  ;;  %v193_v44 = vld [vmem:[#allocation2 + $0xa0] sm:$0xff]  ;;  %v119_v22 = vsub.s32 0, %v802_v1 }
  0x1b   :  { %634 = vmatpush3.msra.mxu1 %v215_v23  ;;  %600 = vmatprep.subr.mxu0 %v198_v24  ;;  %v179_v38 = vld [vmem:[#allocation2 + $0x30] sm:$0xff]  ;;  %v178_v42 = vld [vmem:[#allocation2 + $0x28] sm:$0xff]  ;;  %v225_v45 = vld [vmem:[#allocation2 + $0x1a0] sm:$0xff] }
  0x1c   :  { %635 = vmatprep.subr.mxu1 %v230_v25  ;;  %601 = vmatpush3.msra.mxu0 %v182_v26  ;;  %v211_v39 = vld [vmem:[#allocation2 + $0x130] sm:$0xff]  ;;  %v210_v43 = vld [vmem:[#allocation2 + $0x128] sm:$0xff]  ;;  %v177_v46 = vld [vmem:[#allocation2 + $0x20] sm:$0xff] }
  0x1d   :  { %636 = vmatpush3.msra.mxu1 %v214_v27  ;;  %602 = vmatprep.subr.mxu0 %v197_v28  ;;  %v209_v47 = vld [vmem:[#allocation2 + $0x120] sm:$0xff]  ;;  %v192_v48 = vld [vmem:[#allocation2 + $0x98] sm:$0xff]  ;;  %v35_v54 = vld [vmem:[%s851_s1 + $0x8] sm:$0xff]  ;;  %v127_v28 = vsub.s32 2, %v802_v1 }
  0x1e   :  { %637 = vmatprep.subr.mxu1 %v229_v29  ;;  %603 = vmatpush3.msra.mxu0 %v181_v30  ;;  %v34_v49 = vld [vmem:[%s851_s1] sm:$0xff]  ;;  %v224_v52 = vld [vmem:[#allocation2 + $0x198] sm:$0xff]  ;;  %v39_v55 = vld [vmem:[%s850_s0 + $0x8] sm:$0xff]  ;;  %v123_v30 = vsub.s32 1, %v802_v1 }
  0x1f   :  { %638 = vmatpush3.msra.mxu1 %v213_v31  ;;  %604 = vmatprep.subr.mxu0 %v196_v32  ;;  %v38_v50 = vld [vmem:[%s850_s0] sm:$0xff]  ;;  %v176_v56 = vld [vmem:[#allocation2 + $0x18] sm:$0xff]  ;;  %v43_v58 = vmul.f32 %v39_v55, %v35_v54  ;;  %v191_v59 = vld [vmem:[#allocation2 + $0x90] sm:$0xff] }
  0x20   :  { %639 = vmatprep.subr.mxu1 %v228_v33  ;;  %605 = vmatpush3.msra.mxu0 %v180_v34  ;;  %v42_v53 = vmul.f32 %v38_v50, %v34_v49  ;;  %v208_v57 = vld [vmem:[#allocation2 + $0x118] sm:$0xff]  ;;  %v223_v60 = vld [vmem:[#allocation2 + $0x190] sm:$0xff]  ;;  %v190_v5 = vld [vmem:[#allocation2 + $0x88] sm:$0xff]  ;;  %v131_v33 = vsub.s32 3, %v802_v1 }
  0x21   :  { %640 = vmatpush3.msra.mxu1 %v212_v35  ;;  %606 = vmatprep.subr.mxu0 %v195_v36  ;;  %v175_v63 = vld [vmem:[#allocation2 + $0x10] sm:$0xff]  ;;  %v51_v3 = vcombine.high %v43_v58, %v43_v58  ;;  %v73_v4 = vsel %vm58_vm0, %v43_v58, 0.0  ;;  %v222_v6 = vld [vmem:[#allocation2 + $0x188] sm:$0xff]  ;;  %v189_v14 = vld [vmem:[#allocation2 + $0x80] sm:$0xff] }
  0x22   :  { %641 = vmatprep.subr.mxu1 %v227_v37  ;;  %607 = vmatpush3.msra.mxu0 %v179_v38  ;;  %v50_v61 = vcombine.high %v42_v53, %v42_v53  ;;  %v59_v62 = vsel %vm58_vm0, %v42_v53, 0.0  ;;  %v207_v0 = vld [vmem:[#allocation2 + $0x110] sm:$0xff]  ;;  %v74_v8 = vrot.slane %v73_v4, 4  ;;  %v174_v9 = vld [vmem:[#allocation2 + $0x8] sm:$0xff]  ;;  %v221_v15 = vld [vmem:[#allocation2 + $0x180] sm:$0xff] }
  0x23   :  { %642 = vmatpush3.msra.mxu1 %v211_v39  ;;  %608 = vmatprep.subr.mxu0 %v194_v40  ;;  %v60_v2 = vrot.slane %v59_v62, 4  ;;  %v206_v10 = vld [vmem:[#allocation2 + $0x108] sm:$0xff]  ;;  %v80_v13 = vsel %vm58_vm0, %v51_v3, 0.0  ;;  %v173_v18 = vld [vmem:[#allocation2] sm:$0xff]  ;;  %v268_v25 = vld [vmem:[#allocation2 + $0x2f8] sm:$0xff] }
  0x24   :  { %643 = vmatprep.subr.mxu1 %v226_v41  ;;  %609 = vmatpush3.msra.mxu0 %v178_v42  ;;  %v66_v7 = vsel %vm58_vm0, %v50_v61, 0.0  ;;  %v81_v16 = vrot.slane %v80_v13, 4  ;;  %v75_v17 = vadd.f32 %v74_v8, %v73_v4  ;;  %v205_v20 = vld [vmem:[#allocation2 + $0x100] sm:$0xff]  ;;  %v300_v26 = vld [vmem:[#allocation2 + $0x3f8] sm:$0xff]  ;;  %v251_v61 = vld [vmem:[#allocation2 + $0x270] sm:$0xff] }
  0x25   :  { %644 = vmatpush3.msra.mxu1 %v210_v43  ;;  %610 = vmatprep.subr.mxu0 %v193_v44  ;;  %v67_v11 = vrot.slane %v66_v7, 4  ;;  %v61_v12 = vadd.f32 %v60_v2, %v59_v62  ;;  %v811_v23 = vld [vmem:[%s852_s2] sm:$0xff]  ;;  %v284_v58 = vld [vmem:[#allocation2 + $0x378] sm:$0xff]  ;;  %v283_v62 = vld [vmem:[#allocation2 + $0x370] sm:$0xff] }
  0x26   :  { %645 = vmatprep.subr.mxu1 %v225_v45  ;;  %611 = vmatpush3.msra.mxu0 %v177_v46  ;;  %v82_v24 = vadd.f32 %v81_v16, %v80_v13  ;;  %v76_v27 = vrot.slane %v75_v17, 2  ;;  %v120_v37 = vrot.slane %v811_v23, %v119_v22  ;;  %v128_v40 = vrot.slane %v811_v23, %v127_v28  ;;  %v266_v2 = vld [vmem:[#allocation2 + $0x2e8] sm:$0xff]  ;;  %v37_v4 = vld [vmem:[%s851_s1 + $0x18] sm:$0xff]  ;;  %v297_v13 = vld [vmem:[#allocation2 + $0x3e0] sm:$0xff] }
  0x27   :  { %646 = vmatpush3.msra.mxu1 %v209_v47  ;;  %612 = vmatprep.subr.mxu0 %v192_v48  ;;  %v68_v19 = vadd.f32 %v67_v11, %v66_v7  ;;  %v62_v21 = vrot.slane %v61_v12, 2  ;;  %v124_v42 = vrot.slane %v811_v23, %v123_v30  ;;  %v132_v45 = vrot.slane %v811_v23, %v131_v33  ;;  %v250_v7 = vld [vmem:[#allocation2 + $0x268] sm:$0xff]  ;;  %v296_v22 = vld [vmem:[#allocation2 + $0x3d8] sm:$0xff]  ;;  %v247_v33 = vld [vmem:[#allocation2 + $0x250] sm:$0xff] }
  0x28   :  { %647 = vmatprep.subr.mxu1 %v224_v52  ;;  %613 = vmatpush3.msra.mxu0 %v176_v56  ;;  %v83_v32 = vrot.slane %v82_v24, 2  ;;  %v77_v34 = vadd.f32 %v76_v27, %v75_v17  ;;  %v280_v28 = vld [vmem:[#allocation2 + $0x358] sm:$0xff] }
  0x29   :  { %648 = vmatpush3.msra.mxu1 %v208_v57  ;;  %614 = vmatprep.subr.mxu0 %v191_v59  ;;  %v69_v29 = vrot.slane %v68_v19, 2  ;;  %v63_v31 = vadd.f32 %v62_v21, %v61_v12  ;;  %v252_v57 = vld [vmem:[#allocation2 + $0x278] sm:$0xff]  ;;  %v267_v59 = vld [vmem:[#allocation2 + $0x2f0] sm:$0xff] }
  0x2a   :  { %649 = vmatprep.subr.mxu1 %v223_v60  ;;  %615 = vmatpush3.msra.mxu0 %v175_v63  ;;  %v84_v38 = vadd.f32 %v83_v32, %v82_v24  ;;  %v78_v39 = vrot.slane %v77_v34, 1  ;;  %v299_v60 = vld [vmem:[#allocation2 + $0x3f0] sm:$0xff]  ;;  %v248_v24 = vld [vmem:[#allocation2 + $0x258] sm:$0xff] }
  0x2b   :  { %650 = vmatpush3.msra.mxu1 %v207_v0  ;;  %616 = vmatprep.subr.mxu0 %v190_v5  ;;  %v70_v35 = vadd.f32 %v69_v29, %v68_v19  ;;  %v64_v36 = vrot.slane %v63_v31, 1  ;;  %v36_v63 = vld [vmem:[%s851_s1 + $0x10] sm:$0xff]  ;;  %v41_v5 = vld [vmem:[%s850_s0 + $0x18] sm:$0xff] }
  0x2c   :  { %651 = vmatprep.subr.mxu1 %v222_v6  ;;  %617 = vmatpush3.msra.mxu0 %v174_v9  ;;  %v85_v44 = vrot.slane %v84_v38, 1  ;;  %v79_v46 = vadd.f32 %v78_v39, %v77_v34  ;;  %v40_v0 = vld [vmem:[%s850_s0 + $0x10] sm:$0xff]  ;;  %v298_v6 = vld [vmem:[#allocation2 + $0x3e8] sm:$0xff]  ;;  %v45_v8 = vmul.f32 %v41_v5, %v37_v4  ;;  %v264_v19 = vld [vmem:[#allocation2 + $0x2d8] sm:$0xff]  ;;  %v135_v4 = vsub.s32 4, %v802_v1 }
  0x2d   :  { %652 = vmatpush3.msra.mxu1 %v206_v10  ;;  %618 = vmatprep.subr.mxu0 %v189_v14  ;;  %v71_v41 = vrot.slane %v70_v35, 1  ;;  %v65_v43 = vadd.f32 %v64_v36, %v63_v31  ;;  %v44_v3 = vmul.f32 %v40_v0, %v36_v63  ;;  %v282_v9 = vld [vmem:[#allocation2 + $0x368] sm:$0xff]  ;;  %v265_v10 = vld [vmem:[#allocation2 + $0x2e0] sm:$0xff]  ;;  %v263_v29 = vld [vmem:[#allocation2 + $0x2d0] sm:$0xff] }
  0x2e   :  { %653 = vmatprep.subr.mxu1 %v221_v15  ;;  %619 = vmatpush3.msra.mxu0 %v173_v18  ;;  %v86_v49 = vadd.f32 %v85_v44, %v84_v38  ;;  %v159_v50 = vadd.f32 %v128_v40, %v79_v46  ;;  %v249_v14 = vld [vmem:[#allocation2 + $0x260] sm:$0xff]  ;;  %v53_v15 = vcombine.high %v45_v8, %v45_v8  ;;  %v101_v17 = vsel %vm58_vm0, %v45_v8, 0.0  ;;  %v295_v32 = vld [vmem:[#allocation2 + $0x3d0] sm:$0xff]  ;;  %v262_v36 = vld [vmem:[#allocation2 + $0x2c8] sm:$0xff] }
  0x2f   :  { %654 = vmatpush3.msra.mxu1 %v205_v20  ;;  %658 = vmatprep.subr.mxu0 %v268_v25  ;;  %v72_v47 = vadd.f32 %v71_v41, %v70_v35  ;;  %v157_v48 = vadd.f32 %v120_v37, %v65_v43  ;;  %v52_v11 = vcombine.high %v44_v3, %v44_v3  ;;  %v87_v12 = vsel %vm58_vm0, %v44_v3, 0.0  ;;  %v281_v18 = vld [vmem:[#allocation2 + $0x360] sm:$0xff]  ;;  %v279_v35 = vld [vmem:[#allocation2 + $0x350] sm:$0xff]  ;;  %v294_v39 = vld [vmem:[#allocation2 + $0x3c8] sm:$0xff] }
  0x30   :  { %693 = vmatprep.subr.mxu1 %v300_v26  ;;  %v160_v53 = vadd.f32 %v132_v45, %v86_v49  ;;  %v167_v55 = vmax.f32 %v159_v50, 0.0  ;;  %v88_v16 = vrot.slane %v87_v12, 4  ;;  %v102_v21 = vrot.slane %v101_v17, 4  ;;  %v246_v40 = vld [vmem:[#allocation2 + $0x248] sm:$0xff]  ;;  %v261_v44 = vld [vmem:[#allocation2 + $0x2c0] sm:$0xff]  ;;  %v260_v50 = vld [vmem:[#allocation2 + $0x2b8] sm:$0xff] }
  0x31   :  { %v158_v51 = vadd.f32 %v124_v42, %v72_v47  ;;  %v165_v52 = vmax.f32 %v157_v48, 0.0  ;;  %v94_v20 = vsel %vm58_vm0, %v52_v11, 0.0  ;;  %v108_v26 = vsel %vm58_vm0, %v53_v15, 0.0  ;;  %v278_v43 = vld [vmem:[#allocation2 + $0x348] sm:$0xff]  ;;  %v293_v46 = vld [vmem:[#allocation2 + $0x3c0] sm:$0xff]  ;;  %v275_v63 = vld [vmem:[#allocation2 + $0x330] sm:$0xff] }
  0x32   :  { %v168_v56 = vmax.f32 %v160_v53, 0.0  ;;  %v95_v25 = vrot.slane %v94_v20, 4  ;;  %v89_v27 = vadd.f32 %v88_v16, %v87_v12  ;;  %v109_v30 = vrot.slane %v108_v26, 4  ;;  %v245_v47 = vld [vmem:[#allocation2 + $0x240] sm:$0xff]  ;;  %v292_v53 = vld [vmem:[#allocation2 + $0x3b8] sm:$0xff]  ;;  %v258_v0 = vld [vmem:[#allocation2 + $0x2a8] sm:$0xff] }
  0x33   :  { %v166_v54 = vmax.f32 %v158_v51, 0.0  ;;  %v103_v31 = vadd.f32 %v102_v21, %v101_v17  ;;  %v277_v49 = vld [vmem:[#allocation2 + $0x340] sm:$0xff]  ;;  %v290_v5 = vld [vmem:[#allocation2 + $0x3a8] sm:$0xff]  ;;  %v143_v8 = vsub.s32 6, %v802_v1  ;;  %v256_v17 = vld [vmem:[#allocation2 + $0x298] sm:$0xff] }
  0x34   :  { %436 = vmatprep.mubr.f32.mxu1 %v168_v56  ;;  %v96_v34 = vadd.f32 %v95_v25, %v94_v20  ;;  %v110_v37 = vadd.f32 %v109_v30, %v108_v26  ;;  %v90_v38 = vrot.slane %v89_v27, 2  ;;  %v276_v56 = vld [vmem:[#allocation2 + $0x338] sm:$0xff]  ;;  %v289_v11 = vld [vmem:[#allocation2 + $0x3a0] sm:$0xff]  ;;  %v255_v26 = vld [vmem:[#allocation2 + $0x290] sm:$0xff] }
  0x35   :  { %366 = vmatprep.mubr.f32.mxu0 %v166_v54  ;;  %437 = vmatmul.mubr.f32.vlgmr.msra.gmra.mxu1 %v167_v55  ;;  %v104_v42 = vrot.slane %v103_v31, 2  ;;  %v244_v54 = vld [vmem:[#allocation2 + $0x238] sm:$0xff]  ;;  %v241_v12 = vld [vmem:[#allocation2 + $0x220] sm:$0xff]  ;;  %v271_v30 = vld [vmem:[#allocation2 + $0x310] sm:$0xff] }
  0x36   :  { %367 = vmatmul.mubr.f32.vlgmr.msra.gmra.mxu0 %v165_v52  ;;  %694 = vmatpush3.msra.mxu1 %v284_v58  ;;  %v97_v41 = vrot.slane %v96_v34, 2  ;;  %v111_v45 = vrot.slane %v110_v37, 2  ;;  %v91_v52 = vadd.f32 %v90_v38, %v89_v27  ;;  %v291_v58 = vld [vmem:[#allocation2 + $0x3b0] sm:$0xff]  ;;  %v273_v16 = vld [vmem:[#allocation2 + $0x320] sm:$0xff]  ;;  %v288_v20 = vld [vmem:[#allocation2 + $0x398] sm:$0xff] }
  0x37   :  { %659 = vmatpush3.msra.mxu0 %v252_v57  ;;  %695 = vmatprep.subr.mxu1 %v299_v60  ;;  %v105_v55 = vadd.f32 %v104_v42, %v103_v31  ;;  %v259_v57 = vld [vmem:[#allocation2 + $0x2b0] sm:$0xff]  ;;  %v240_v21 = vld [vmem:[#allocation2 + $0x218] sm:$0xff]  ;;  %v254_v31 = vld [vmem:[#allocation2 + $0x288] sm:$0xff] }
  0x38   :  { %660 = vmatprep.subr.mxu0 %v267_v59  ;;  %696 = vmatpush3.msra.mxu1 %v283_v62  ;;  %v98_v48 = vadd.f32 %v97_v41, %v96_v34  ;;  %v112_v51 = vadd.f32 %v111_v45, %v110_v37  ;;  %v243_v59 = vld [vmem:[#allocation2 + $0x230] sm:$0xff]  ;;  %v147_v62 = vsub.s32 7, %v802_v1  ;;  %v92_v3 = vrot.slane %v91_v52, 1  ;;  %v272_v25 = vld [vmem:[#allocation2 + $0x318] sm:$0xff]  ;;  %v286_v34 = vld [vmem:[#allocation2 + $0x388] sm:$0xff] }
  0x39   :  { %661 = vmatpush3.msra.mxu0 %v251_v61  ;;  %697 = vmatprep.subr.mxu1 %v298_v6  ;;  %v139_v61 = vsub.s32 5, %v802_v1  ;;  %v242_v6 = vld [vmem:[#allocation2 + $0x228] sm:$0xff]  ;;  %v136_v1 = vrot.slane %v811_v23, %v135_v4  ;;  %v287_v27 = vld [vmem:[#allocation2 + $0x390] sm:$0xff]  ;;  %v253_v37 = vld [vmem:[#allocation2 + $0x280] sm:$0xff] }
  0x3a   :  { %662 = vmatprep.subr.mxu0 %v266_v2  ;;  %698 = vmatpush3.msra.mxu1 %v282_v9  ;;  %v99_v60 = vrot.slane %v98_v48, 1  ;;  %v113_v2 = vrot.slane %v112_v51, 1  ;;  %v274_v9 = vld [vmem:[#allocation2 + $0x328] sm:$0xff]  ;;  %v148_v15 = vrot.slane %v811_v23, %v147_v62  ;;  %v285_v38 = vld [vmem:[#allocation2 + $0x380] sm:$0xff] }
  0x3b   :  { %663 = vmatpush3.msra.mxu0 %v250_v7  ;;  %699 = vmatprep.subr.mxu1 %v297_v13  ;;  %v106_v7 = vrot.slane %v105_v55, 1  ;;  %v269_v41 = vld [vmem:[#allocation2 + $0x300] sm:$0xff] }
  0x3c   :  { %664 = vmatprep.subr.mxu0 %v265_v10  ;;  %700 = vmatpush3.msra.mxu1 %v281_v18  ;;  %v257_v10 = vld [vmem:[#allocation2 + $0x2a0] sm:$0xff]  ;;  %v100_v13 = vadd.f32 %v99_v60, %v98_v48  ;;  %v114_v18 = vadd.f32 %v113_v2, %v112_v51 }
  0x3d   :  { %665 = vmatpush3.msra.mxu0 %v249_v14  ;;  %701 = vmatprep.subr.mxu1 %v296_v22  ;;  %v140_v14 = vrot.slane %v811_v23, %v139_v61  ;;  %v107_v22 = vadd.f32 %v106_v7, %v105_v55 }
  0x3e   :  { %666 = vmatprep.subr.mxu0 %v264_v19  ;;  %702 = vmatpush3.msra.mxu1 %v280_v28  ;;  %v93_v19 = vadd.f32 %v92_v3, %v91_v52  ;;  %v239_v28 = vld [vmem:[#allocation2 + $0x210] sm:$0xff] }
  0x3f   :  { %667 = vmatpush3.msra.mxu0 %v248_v24  ;;  %703 = vmatprep.subr.mxu1 %v295_v32  ;;  %v144_v24 = vrot.slane %v811_v23, %v143_v8  ;;  %v164_v32 = vadd.f32 %v148_v15, %v114_v18 }
  0x40   :  { %668 = vmatprep.subr.mxu0 %v263_v29  ;;  %704 = vmatpush3.msra.mxu1 %v279_v35  ;;  %v162_v29 = vadd.f32 %v140_v14, %v100_v13  ;;  %v238_v35 = vld [vmem:[#allocation2 + $0x208] sm:$0xff] }
  0x41   :  { %669 = vmatpush3.msra.mxu0 %v247_v33  ;;  %705 = vmatprep.subr.mxu1 %v294_v39  ;;  %v161_v33 = vadd.f32 %v136_v1, %v93_v19  ;;  %v163_v23 = vadd.f32 %v144_v24, %v107_v22  ;;  %v237_v39 = vld [vmem:[#allocation2 + $0x200] sm:$0xff]  ;;  %v172_v42 = vmax.f32 %v164_v32, 0.0 }
  0x42   :  { %670 = vmatprep.subr.mxu0 %v262_v36  ;;  %706 = vmatpush3.msra.mxu1 %v278_v43  ;;  %v270_v36 = vld [vmem:[#allocation2 + $0x308] sm:$0xff] }
  0x43   :  { %671 = vmatpush3.msra.mxu0 %v246_v40  ;;  %707 = vmatprep.subr.mxu1 %v293_v46  ;;  %v170_v40 = vmax.f32 %v162_v29, 0.0  ;;  %v169_v43 = vmax.f32 %v161_v33, 0.0 }
  0x44   :  { %672 = vmatprep.subr.mxu0 %v261_v44  ;;  %708 = vmatpush3.msra.mxu1 %v277_v49  ;;  %v171_v44 = vmax.f32 %v163_v23, 0.0  ;;  %v301_v49 = vld [vmem:[%s854_s4] sm:$0x1] }
  0x45   :  { %673 = vmatpush3.msra.mxu0 %v245_v47  ;;  %709 = vmatprep.subr.mxu1 %v292_v53 }
  0x46   :  { %674 = vmatprep.subr.mxu0 %v260_v50  ;;  %710 = vmatpush3.msra.mxu1 %v276_v56 }
  0x47   :  { %675 = vmatpush3.msra.mxu0 %v244_v54  ;;  %711 = vmatprep.subr.mxu1 %v291_v58 }
  0x48   :  { %676 = vmatprep.subr.mxu0 %v259_v57  ;;  %712 = vmatpush3.msra.mxu1 %v275_v63 }
  0x49   :  { %677 = vmatpush3.msra.mxu0 %v243_v59  ;;  %713 = vmatprep.subr.mxu1 %v290_v5 }
  0x4a   :  { %678 = vmatprep.subr.mxu0 %v258_v0  ;;  %714 = vmatpush3.msra.mxu1 %v274_v9 }
  0x4b   :  { %679 = vmatpush3.msra.mxu0 %v242_v6  ;;  %715 = vmatprep.subr.mxu1 %v289_v11 }
  0x4c   :  { %680 = vmatprep.subr.mxu0 %v257_v10  ;;  %716 = vmatpush3.msra.mxu1 %v273_v16 }
  0x4d   :  { %681 = vmatpush3.msra.mxu0 %v241_v12  ;;  %717 = vmatprep.subr.mxu1 %v288_v20 }
  0x4e   :  { %682 = vmatprep.subr.mxu0 %v256_v17  ;;  %718 = vmatpush3.msra.mxu1 %v272_v25 }
  0x4f   :  { %683 = vmatpush3.msra.mxu0 %v240_v21  ;;  %719 = vmatprep.subr.mxu1 %v287_v27 }
  0x50   :  { %684 = vmatprep.subr.mxu0 %v255_v26  ;;  %720 = vmatpush3.msra.mxu1 %v271_v30 }
  0x51   :  { %685 = vmatpush3.msra.mxu0 %v239_v28  ;;  %721 = vmatprep.subr.mxu1 %v286_v34 }
  0x52   :  { %686 = vmatprep.subr.mxu0 %v254_v31  ;;  %722 = vmatpush3.msra.mxu1 %v270_v36 }
  0x53   :  { %687 = vmatpush3.msra.mxu0 %v238_v35  ;;  %723 = vmatprep.subr.mxu1 %v285_v38 }
  0x54   :  { %688 = vmatprep.subr.mxu0 %v253_v37  ;;  %506 = vmatprep.mubr.f32.mxu0 %v170_v40 }
  0x55   :  { %689 = vmatpush3.msra.mxu0 %v237_v39  ;;  %724 = vmatpush3.msra.mxu1 %v269_v41 }
  0x56   :  { %576 = vmatprep.mubr.f32.mxu1 %v172_v42  ;;  %507 = vmatmul.mubr.f32.vlgmr.msra.gmra.mxu0 %v169_v43 }
  0x57   :  { %577 = vmatmul.mubr.f32.vlgmr.msra.gmra.mxu1 %v171_v44 }
  0xf5   :  { %v655_v46 = vpop.f32.mrf.mxu1 }
  0xf6   :  { %v620_v45 = vpop.f32.mrf.mxu0 }
  0xf7   :  { %v656_v50 = vpop.f32.mrf.mxu1 }
  0xf8   :  { %v621_v47 = vpop.f32.mrf.mxu0  ;;  %v657_v52 = vadd.f32 %v656_v50, %v655_v46 }
  0xf9   :  { %v622_v48 = vadd.f32 %v621_v47, %v620_v45 }
  0xfb   :  { %v369_v51 = vadd.f32 %v622_v48, %v301_v49 }
  0xfd   :  { %v439_v56 = vadd.f32 %v657_v52, %v369_v51 }
 0x116   :  { %v690_v53 = vpop.f32.mrf.mxu0 }
 0x117   :  { %v725_v54 = vpop.f32.mrf.mxu1 }
 0x118   :  { %v691_v55 = vpop.f32.mrf.mxu0 }
 0x119   :  { %v692_v57 = vadd.f32 %v691_v55, %v690_v53  ;;  %v726_v58 = vpop.f32.mrf.mxu1 }
 0x11a   :  { %v727_v60 = vadd.f32 %v726_v58, %v725_v54 }
 0x11b   :  { %v509_v59 = vadd.f32 %v692_v57, %v439_v56 }
 0x11d   :  { %v579_v61 = vadd.f32 %v727_v60, %v509_v59 }
 0x11f   :  { %582 = vst [vmem:[%s855_s5] sm:$0x1] %v579_v61 }
 0x120   :  { %587 = vsyncpa [#allocation3], 1 }

</bundles_post_ra>
